<compile_context>
chip_gen: v7x
topology: tpu7x:2x2x1
jax: 0.10.0
libtpu: 0.0.40
codegen_flags: <defaults>
</compile_context>

<pallas_src>
import functools
import warnings

import jax
import jax.numpy as jnp
from jax.experimental import pallas as pl
from jax.experimental.pallas import tpu as pltpu

_LANE = 128
_MAX_BLOCK_ROWS = 1024          # 1024 x 128 x 4 B = 512 KiB per f32 buffer


def _round_up(x, m):
    return ((x + m - 1) // m) * m


def _slab_rows(n_elems):
    """(padded rows, block rows) for an n-element lane-dense slab."""
    r = pl.cdiv(n_elems, _LANE)
    tr = min(_round_up(r, 16), _MAX_BLOCK_ROWS)   # multiple of 16 -> aligned halves
    rp = _round_up(r, tr)
    return rp, tr


# ----------------------------------------------------------------------------
# In-kernel math helpers (pure jnp; portable to compiled + interpret mode)
# ----------------------------------------------------------------------------
def _bits_to_uniform(bits):
    """uint32 -> U[0, 1) using the top 24 bits."""
    return (bits >> 8).astype(jnp.float32) * (1.0 / (1 << 24))


def _box_muller(bits):
    """uint32 bits of shape (..., 2*half, 128) -> N(0,1) of the same shape.

    Uses both Box-Muller outputs (cos and sin branches) so every 32-bit draw
    yields one normal sample and transcendental work per element is halved.
    +0.5 keeps the uniform strictly inside (0,1) so log() is finite; the tail
    is truncated at |z| ~ 5.9, which is fine for noise injection.
    """
    half = bits.shape[-2] // 2
    u = ((bits >> 8).astype(jnp.float32) + 0.5) * (1.0 / (1 << 24))
    u1 = u[..., :half, :]
    u2 = u[..., half:, :]
    r = jnp.sqrt(-2.0 * jnp.log(u1))
    theta = (2.0 * jnp.pi) * u2
    return jnp.concatenate([r * jnp.cos(theta), r * jnp.sin(theta)], axis=-2)


# ----------------------------------------------------------------------------
# Kernels
# ----------------------------------------------------------------------------
def _uniform_gaussian_kernel(x_ref, bits_ref, sigma_ref, o_ref):
    # x_ref, bits_ref, o_ref: (1, TR, 128); sigma_ref: (1, 1, 1)
    z = _box_muller(bits_ref[...])
    sig = sigma_ref[...]                                   # broadcasts over tile
    y = x_ref[...].astype(jnp.float32) + sig * z
    o_ref[...] = y.astype(o_ref.dtype)


def _rand_kernel(bits_ref, o_ref):
    # uniform_() equivalent: U[0, 1)
    o_ref[...] = _bits_to_uniform(bits_ref[...]).astype(o_ref.dtype)


def _randn_kernel(bits_ref, o_ref):
    # normal_() equivalent: N(0, 1)
    o_ref[...] = _box_muller(bits_ref[...]).astype(o_ref.dtype)


# ----------------------------------------------------------------------------
# Wrappers
# ----------------------------------------------------------------------------
def _uniform_gaussian_forward_impl(x, k_sigma, k_noise, sigma_min, sigma_max):
    batch = x.shape[0]
    m = 1
    for d in x.shape[1:]:
        m *= d
    rp, tr = _slab_rows(m)
    mp = rp * _LANE

    # per-batch sigma ~ U(sigma_min, sigma_max), shape (B, 1, 1)
    sigma_u = jax.random.uniform(k_sigma, (batch, 1, 1), dtype=jnp.float32)
    sigma = sigma_u * (sigma_max - sigma_min) + sigma_min

    # one 32-bit uniform draw per output element (both Box-Muller outputs used)
    bits = jax.random.bits(k_noise, (batch, rp, _LANE), dtype=jnp.uint32)

    xf = x.reshape(batch, m)
    if mp != m:
        xf = jnp.pad(xf, ((0, 0), (0, mp - m)))
    xs = xf.reshape(batch, rp, _LANE)

    n_elems = batch * mp
    out = pl.pallas_call(
        _uniform_gaussian_kernel,
        out_shape=jax.ShapeDtypeStruct((batch, rp, _LANE), x.dtype),
        grid=(batch, rp // tr),
        in_specs=[
            pl.BlockSpec((1, tr, _LANE), lambda b, j: (b, j, 0)),   # x
            pl.BlockSpec((1, tr, _LANE), lambda b, j: (b, j, 0)),   # bits
            pl.BlockSpec((1, 1, 1), lambda b, j: (b, 0, 0)),        # sigma_b
        ],
        out_specs=pl.BlockSpec((1, tr, _LANE), lambda b, j: (b, j, 0)),
        compiler_params=pltpu.CompilerParams(
            dimension_semantics=("parallel", "parallel")),
        cost_estimate=pl.CostEstimate(
            flops=12 * n_elems,
            transcendentals=2 * n_elems,
            bytes_accessed=3 * 4 * n_elems),
    )(xs, bits, sigma)

    if mp != m:
        out = out.reshape(batch, mp)[:, :m]
    return out.reshape(x.shape)


uniform_gaussian_forward = jax.jit(_uniform_gaussian_forward_impl)


def _slab_random_impl(kernel, x, key):
    n = x.size
    rp, tr = _slab_rows(n)
    bits = jax.random.bits(key, (rp, _LANE), dtype=jnp.uint32)
    out = pl.pallas_call(
        kernel,
        out_shape=jax.ShapeDtypeStruct((rp, _LANE), x.dtype),
        grid=(rp // tr,),
        in_specs=[pl.BlockSpec((tr, _LANE), lambda i: (i, 0))],
        out_specs=pl.BlockSpec((tr, _LANE), lambda i: (i, 0)),
        compiler_params=pltpu.CompilerParams(
            dimension_semantics=("parallel",)),
    )(bits)
    return out.reshape(-1)[:n].reshape(x.shape)


pallas_rand_like = jax.jit(functools.partial(_slab_random_impl, _rand_kernel))
pallas_randn_like = jax.jit(functools.partial(_slab_random_impl, _randn_kernel))


# ----------------------------------------------------------------------------
# NoiseModel / UniformGaussianNoise (JAX / Pallas versions of the PyTorch classes)
# ----------------------------------------------------------------------------
class NoiseModel:
    """Base noise model. Default noise model is the identity N(y) = y.

    `rng` is an integer seed standing in for a torch.Generator; internal state
    is a jax.random key advanced on every draw.
    """

    def __init__(self, noise_model=None, rng=None):
        if noise_model is None:
            # Identity: short-circuit (no Pallas round trip, no HBM copies).
            noise_model = lambda x: x
        self.noise_model = noise_model
        self.rng = rng
        if rng is not None:
            self.initial_random_state = rng
        self._key = jax.random.PRNGKey(0 if rng is None else rng)

    def forward(self, x, seed=None):
        self.rng_manual_seed(seed)
        return self.noise_model(x)

    def __call__(self, *args, **kwargs):
        return self.forward(*args, **kwargs)

    def __mul__(self, other):
        noise_model = lambda x: self.noise_model(other.noise_model(x))
        return NoiseModel(noise_model=noise_model, rng=self.rng)

    def rng_manual_seed(self, seed=None):
        if seed is not None:
            if self.rng is not None:
                self.rng = seed
                self._key = jax.random.PRNGKey(seed)
            else:
                warnings.warn(
                    "Cannot set seed for random number generator because it is "
                    "not initialized. The `seed` parameter is ignored.")

    def reset_rng(self):
        self.rng = self.initial_random_state
        self._key = jax.random.PRNGKey(self.rng)

    def _next_key(self):
        self._key, sub = jax.random.split(self._key)
        return sub

    def rand_like(self, x, seed=None):
        self.rng_manual_seed(seed)
        return pallas_rand_like(x, self._next_key())

    def randn_like(self, x, seed=None):
        self.rng_manual_seed(seed)
        return pallas_randn_like(x, self._next_key())


class UniformGaussianNoise(NoiseModel):
    """y = x + eps, eps ~ N(0, sigma^2 I), sigma ~ U(sigma_min, sigma_max) per batch."""

    def __init__(self, sigma_min=0.0, sigma_max=0.5, rng=None):
        super().__init__(rng=rng)
        self.sigma_min = sigma_min
        self.sigma_max = sigma_max

    def forward(self, x, seed=None, **kwargs):
        self.rng_manual_seed(seed)
        k_sigma = self._next_key()
        k_noise = self._next_key()
        return uniform_gaussian_forward(
            x, k_sigma, k_noise,
            jnp.float32(self.sigma_min), jnp.float32(self.sigma_max))


# ----------------------------------------------------------------------------
if __name__ == "__main__":
    key = jax.random.PRNGKey(0)
    x = jax.random.normal(key, (2, 4, 16, 16), dtype=jnp.float32)   # NCHW

    # --- UniformGaussianNoise forward (the fused Pallas kernel) ---
    model = UniformGaussianNoise(sigma_min=0.0, sigma_max=0.5, rng=1234)
    y = jax.block_until_ready(model(x, seed=42))
    assert y.shape == x.shape and y.dtype == x.dtype
    noise = y - x
    assert bool(jnp.all(jnp.isfinite(noise)))
    # |noise| <= sigma_max * |z|_max (~0.5 * 5.9)
    assert float(jnp.max(jnp.abs(noise))) < 5.0

    # seeded reproducibility
    y2 = jax.block_until_ready(model(x, seed=42))
    assert jnp.allclose(y, y2), "seeded forward not reproducible"

    # --- base-class identity noise model (short-circuit, no Pallas) ---
    base = NoiseModel(rng=1)
    yid = jax.block_until_ready(base(x, seed=3))
    assert jnp.allclose(yid, x), "identity forward mismatch"

    composed = base * NoiseModel()
    assert jnp.allclose(jax.block_until_ready(composed(x)), x)

    # --- RNG helper kernels ---
    u = jax.block_until_ready(model.rand_like(x, seed=7))
    g = jax.block_until_ready(model.randn_like(x, seed=7))
    assert u.shape == x.shape and g.shape == x.shape
    assert bool(jnp.all(u >= 0.0)) and bool(jnp.all(u < 1.0))
    assert abs(float(jnp.mean(u)) - 0.5) < 0.1
    assert abs(float(jnp.mean(g))) < 0.2
    assert abs(float(jnp.std(g)) - 1.0) < 0.2

    # same seed -> same numbers, across instances too
    u_again = jax.block_until_ready(model.rand_like(x, seed=7))
    assert jnp.allclose(u, u_again), "seeded rand_like not reproducible"
    other = UniformGaussianNoise(rng=999)
    u_other = jax.block_until_ready(other.rand_like(x, seed=7))
    assert jnp.allclose(u, u_other)

    print("KERNEL_OK")
</pallas_src>

<mosaic_0001>
module attributes {stable_mosaic.version = 11 : i64} {
  func.func @_uniform_gaussian_kernel(%arg0: i32, %arg1: i32, %arg2: memref<1x16x128xf32, #tpu.memory_space<vmem>>, %arg3: memref<1x16x128xi32, #tpu.memory_space<vmem>>, %arg4: memref<1x1x1xf32, #tpu.memory_space<vmem>>, %arg5: memref<1x16x128xf32, #tpu.memory_space<vmem>>) attributes {dimension_semantics = [#tpu.dimension_semantics<parallel>, #tpu.dimension_semantics<parallel>], iteration_bounds = array<i64: 2, 1>, scalar_prefetch = 0 : i64, scratch_operands = 0 : i64, tpu.core_type = #tpu.core_type<tc>, window_params = [{transform_indices = @transform_0, window_bounds = array<i64: 1, 16, 128>}, {transform_indices = @transform_1, window_bounds = array<i64: 1, 16, 128>}, {transform_indices = @transform_2, window_bounds = array<i64: 1, 1, 1>}, {transform_indices = @transform_3, window_bounds = array<i64: 1, 16, 128>}]} {
    %c0 = arith.constant 0 : index
    %c0_0 = arith.constant 0 : index
    %c0_1 = arith.constant 0 : index
    %0 = vector.load %arg3[%c0, %c0_0, %c0_1] : memref<1x16x128xi32, #tpu.memory_space<vmem>>, vector<1x16x128xi32>
    %c8_i32 = arith.constant 8 : i32
    %1 = vector.broadcast %c8_i32 : i32 to vector<1x16x128xi32>
    %2 = arith.shrui %0, %1 : vector<1x16x128xi32>
    %3 = arith.uitofp %2 : vector<1x16x128xi32> to vector<1x16x128xf32>
    %cst = arith.constant 5.000000e-01 : f32
    %4 = vector.broadcast %cst : f32 to vector<1x16x128xf32>
    %5 = arith.addf %3, %4 : vector<1x16x128xf32>
    %cst_2 = arith.constant 5.96046448E-8 : f32
    %6 = vector.broadcast %cst_2 : f32 to vector<1x16x128xf32>
    %7 = arith.mulf %5, %6 : vector<1x16x128xf32>
    %8 = vector.extract_strided_slice %7 {offsets = [0, 0, 0], sizes = [1, 8, 128], strides = [1, 1, 1]} : vector<1x16x128xf32> to vector<1x8x128xf32>
    %9 = vector.extract_strided_slice %7 {offsets = [0, 8, 0], sizes = [1, 8, 128], strides = [1, 1, 1]} : vector<1x16x128xf32> to vector<1x8x128xf32>
    %10 = math.log %8 : vector<1x8x128xf32>
    %cst_3 = arith.constant -2.000000e+00 : f32
    %11 = vector.broadcast %cst_3 : f32 to vector<1x8x128xf32>
    %12 = arith.mulf %11, %10 : vector<1x8x128xf32>
    %13 = math.sqrt %12 : vector<1x8x128xf32>
    %cst_4 = arith.constant 6.28318548 : f32
    %14 = vector.broadcast %cst_4 : f32 to vector<1x8x128xf32>
    %15 = arith.mulf %14, %9 : vector<1x8x128xf32>
    %16 = math.cos %15 : vector<1x8x128xf32>
    %17 = arith.mulf %13, %16 : vector<1x8x128xf32>
    %18 = math.sin %15 : vector<1x8x128xf32>
    %19 = arith.mulf %13, %18 : vector<1x8x128xf32>
    %20 = tpu.concatenate %17, %19 in 1 : vector<1x8x128xf32>, vector<1x8x128xf32> -> vector<1x16x128xf32>
    %c0_5 = arith.constant 0 : index
    %c0_6 = arith.constant 0 : index
    %c0_7 = arith.constant 0 : index
    %21 = vector.load %arg4[%c0_5, %c0_6, %c0_7] : memref<1x1x1xf32, #tpu.memory_space<vmem>>, vector<1x1x1xf32>
    %c0_8 = arith.constant 0 : index
    %c0_9 = arith.constant 0 : index
    %c0_10 = arith.constant 0 : index
    %22 = vector.load %arg2[%c0_8, %c0_9, %c0_10] : memref<1x16x128xf32, #tpu.memory_space<vmem>>, vector<1x16x128xf32>
    %23 = vector.broadcast %21 : vector<1x1x1xf32> to vector<1x16x128xf32>
    %24 = arith.mulf %23, %20 : vector<1x16x128xf32>
    %25 = arith.addf %22, %24 : vector<1x16x128xf32>
    %c0_11 = arith.constant 0 : index
    %c0_12 = arith.constant 0 : index
    %c0_13 = arith.constant 0 : index
    %26 = vector.load %arg5[%c0_11, %c0_12, %c0_13] : memref<1x16x128xf32, #tpu.memory_space<vmem>>, vector<1x16x128xf32>
    tpu.vector_store %arg5[%c0_11, %c0_12, %c0_13], %25 {strides = array<i32>} : memref<1x16x128xf32, #tpu.memory_space<vmem>>, vector<1x16x128xf32>,
    return
  }
  func.func @transform_0(%arg0: i32, %arg1: i32) -> (i32, i32, i32) {
    %c0_i32 = arith.constant 0 : i32
    %c0_i32_0 = arith.constant 0 : i32
    return %arg0, %arg1, %c0_i32 : i32, i32, i32
  }
  func.func @transform_1(%arg0: i32, %arg1: i32) -> (i32, i32, i32) {
    %c0_i32 = arith.constant 0 : i32
    %c0_i32_0 = arith.constant 0 : i32
    return %arg0, %arg1, %c0_i32 : i32, i32, i32
  }
  func.func @transform_2(%arg0: i32, %arg1: i32) -> (i32, i32, i32) {
    %c0_i32 = arith.constant 0 : i32
    %c0_i32_0 = arith.constant 0 : i32
    %c0_i32_1 = arith.constant 0 : i32
    return %arg0, %c0_i32, %c0_i32_0 : i32, i32, i32
  }
  func.func @transform_3(%arg0: i32, %arg1: i32) -> (i32, i32, i32) {
    %c0_i32 = arith.constant 0 : i32
    %c0_i32_0 = arith.constant 0 : i32
    return %arg0, %arg1, %c0_i32 : i32, i32, i32
  }
}

</mosaic_0001>

<bundles_post_ra>
// kernel: _uniform_gaussian_forward_impl.1
= control target key start
LH: loop header
LB: loop body
LE: loop exit
PB: predicated region body
PF: predicated region fallthrough
CT: control target
= control target key end

     0   :  { %s752_s12 = smov 0   ;;  %s754_s13 = smov 0   ;;  %s821_s0 = inlined_call_operand.vmem [shape: f32[2,16,128], index: 0, kind: input, shape index: {}]   ;;  %s822_s1 = inlined_call_operand.vmem [shape: u32[2,16,128], index: 1, kind: input, shape index: {}]   ;;  %s823_s2 = inlined_call_operand.vmem [shape: f32[2,1,1], index: 2, kind: input, shape index: {}]   ;;  %s824_s3 = inlined_call_operand.vmem [shape: f32[2,16,128], index: 3, kind: output, shape index: {}]  }
   0x1   :  { %s756_s14 = smov 0  }
   0x2 LB: > { %s25_s15 = sadd.s32 1, %s719_s13  ;;  %p636_p0 = scmp.ge.s32.totalorder %s723_s14, 1  ;;  %s723_s14 = sphi %s756_s14, %s13_s14   ;;  %s719_s13 = sphi %s754_s13, %s826_s13   ;;  %s715_s12 = sphi %s752_s12, %s825_s12  }
   0x3   : > { %p27_p1 = scmp.ge.s32.totalorder %s25_s15, 2  ;;  %p183_p2 = scmp.lt.s32.totalorder %s723_s14, 3 }
   0x5   : > { %s828_s15 = smov (%p27_p1, %s25_s15), 0  ;;  %p184_p3 = pnand %p636_p0, %p183_p2 }
   0x6   : > { %p228_p4 = scmp.lt.s32.totalorder (!%p184_p3), %s715_s12, 1  ;;  %v725_v0 = vmov (!%p184_p3), 0   ;;  %v726_v24 = vmov (!%p184_p3), 683565275   ;;  %v727_v26 = vmov (!%p184_p3), 2475754826  }
   0x7   : > { %187 = sbr.rel (%p184_p3) target bundleno = 150 (0x96), region = 32  ;;  %692 = vset.pattern.permute.xlu0 (!%p184_p3), %v725_v0  ;;  %v728_v28 = vmov (!%p184_p3), 2131351028   ;;  %v729_v34 = vmov (!%p184_p3), 2102212464  }
   0x8   : > { %v730_v37 = vmov (!%p184_p3), 920167782   ;;  %v731_v40 = vmov (!%p184_p3), 1326507024  }
   0xe   : > { %s830_s12 = smov (!%p228_p4, %s715_s12), 1 }
   0xf   : > { %s249_s18 = scalar_lea.vmem %s823_s2, %s830_s12  ;;  %s773_s19 = sshll.u32 %s830_s12, 4 }
  0x10   : > { %v651_v1 = vld [vmem:[%s249_s18] ss:$0 sm:$0xff]  ;;  %s779_s22 = scalar_lea.vmem %s822_s1, %s773_s19  ;;  %s235_s25 = scalar_lea.vmem %s821_s0, %s773_s19 }
  0x11   : > { %509 = vperm.xlu0 %692, %v651_v1   ;;  %v261_v2 = vld [vmem:[%s779_s22 + $0x8] sm:$0xff]  ;;  %s258_s28 = scalar_lea.vmem %s824_s3, %s773_s19 }
  0x12   : > { %v263_v3 = vshrl.u32 %v261_v2, 8 }
  0x14   : > { %v270_v4 = vshrl.u32 %v263_v3, 16  ;;  %v271_v5 = vand.u32 65535, %v263_v3 }
  0x16   : > { %v272_v6 = vcvt.s32.f32 %v270_v4  ;;  %v274_v7 = vcvt.s32.f32 %v271_v5  ;;  %v260_v4 = vld [vmem:[%s779_s22] sm:$0xff] }
  0x18   : > { %v273_v8 = vmul.f32 65536.0, %v272_v6  ;;  %v262_v6 = vshrl.u32 %v260_v4, 8  ;;  %v502_v4 = vld [vmem:[%s235_s25 + $0x8] sm:$0xff] }
  0x1a   : > { %v275_v9 = vadd.f32 %v274_v7, %v273_v8 }
  0x1c   : > { %v277_v10 = vadd.f32 0.5, %v275_v9  ;;  %v264_v9 = vshrl.u32 %v262_v6, 16 }
  0x1e   : > { %v279_v11 = vmul.f32 5.9604645e-08, %v277_v10 }
  0x20   : > { %v782_v12 = vmul.f32 6.2831855, %v279_v11 }
  0x22   : > { %v294_v13 = vand.u32 2139095040, %v782_v12  ;;  %v291_v14 = vand.u32 2147483647, %v782_v12  ;;  %vm293_vm7 = vcmp.lt.s32.totalorder %v782_v12, 0 }
  0x24   : > { %v295_v15 = vshrl.u32 %v294_v13, 23  ;;  %v298_v17 = vand.u32 8388607, %v291_v14  ;;  %v265_v13 = vand.u32 65535, %v262_v6  ;;  %vm292_vm8 = vcmp.le.f32.partialorder %v291_v14, 0.7853982 }
  0x26   : > { %v643_v16 = vadd.s32 4294967169, %v295_v15  ;;  %v299_v20 = vor.u32 8388608, %v298_v17  ;;  %v266_v15 = vcvt.s32.f32 %v264_v9 }
  0x28   : > { %v301_v18 = vadd.s32 1, %v643_v16  ;;  %v339_v30 = vshll.u32 %v299_v20, 8 }
  0x2a   : > { %vm302_vm0 = vcmp.gt.s32.totalorder %v301_v18, 0 }
  0x2b   : > { %v303_v19 = vsel %vm302_vm0, %v301_v18, 0  ;;  %v267_v18 = vmul.f32 65536.0, %v266_v15  ;;  %vm383_vm0 = vweird.f32 %v782_v12 }
  0x2c   : > { %v305_v21 = vand.u32 31, %v303_v19  ;;  %v304_v22 = vshrl.u32 %v303_v19, 5  ;;  %v268_v19 = vcvt.s32.f32 %v265_v13 }
  0x2e   : > { %v306_v23 = vsub.s32 32, %v305_v21  ;;  %v308_v25 = vshll.u32 %v726_v24, %v305_v21  ;;  %v311_v27 = vshll.u32 %v727_v26, %v305_v21  ;;  %v314_v29 = vshll.u32 %v728_v28, %v305_v21 }
  0x2f   : > { %v317_v36 = vshll.u32 %v729_v34, %v305_v21  ;;  %v320_v39 = vshll.u32 %v730_v37, %v305_v21  ;;  %vm323_vm1 = vcmp.lt.s32.totalorder %v304_v22, 1  ;;  %vm324_vm2 = vcmp.lt.s32.totalorder %v304_v22, 2 }
  0x30   : > { %v307_v31 = vshrl.u32 %v726_v24, %v306_v23  ;;  %v309_v32 = vshrl.u32 %v727_v26, %v306_v23  ;;  %v312_v33 = vshrl.u32 %v728_v28, %v306_v23  ;;  %v315_v35 = vshrl.u32 %v729_v34, %v306_v23 }
  0x31   : > { %v318_v38 = vshrl.u32 %v730_v37, %v306_v23  ;;  %v321_v41 = vshrl.u32 %v731_v40, %v306_v23  ;;  %vm325_vm3 = vcmp.lt.s32.totalorder %v304_v22, 3  ;;  %vm326_vm4 = vcmp.lt.s32.totalorder %v304_v22, 4 }
  0x32   : > { %v310_v42 = vor.u32 %v309_v32, %v308_v25  ;;  %v313_v43 = vor.u32 %v312_v33, %v311_v27  ;;  %v316_v44 = vor.u32 %v315_v35, %v314_v29  ;;  %v269_v24 = vadd.f32 %v268_v19, %v267_v18 }
  0x33   : > { %v319_v45 = vor.u32 %v318_v38, %v317_v36  ;;  %v322_v46 = vor.u32 %v321_v41, %v320_v39 }
  0x34   : > { %v327_v47 = vsel %vm323_vm1, %v307_v31, %v310_v42  ;;  %v331_v48 = vsel %vm323_vm1, %v310_v42, %v313_v43  ;;  %v335_v49 = vsel %vm323_vm1, %v313_v43, %v316_v44  ;;  %v328_v50 = vsel %vm326_vm4, %v316_v44, 2102212464 }
  0x35   : > { %v332_v51 = vsel %vm326_vm4, %v319_v45, 920167782  ;;  %v336_v52 = vsel %vm326_vm4, %v322_v46, 1326507024  ;;  %v329_v53 = vsel %vm325_vm3, %v313_v43, %v328_v50  ;;  %v276_v29 = vadd.f32 0.5, %v269_v24 }
  0x36   : > { %v333_v54 = vsel %vm325_vm3, %v316_v44, %v332_v51  ;;  %v337_v55 = vsel %vm325_vm3, %v319_v45, %v336_v52  ;;  %v330_v56 = vsel %vm324_vm2, %v327_v47, %v329_v53 }
  0x37   : > { %v334_v57 = vsel %vm324_vm2, %v331_v48, %v333_v54  ;;  %v338_v58 = vsel %vm324_vm2, %v335_v49, %v337_v55  ;;  %v346_v63 = vmul.u32 %v339_v30, %v330_v56  ;;  %v278_v32 = vmul.f32 5.9604645e-08, %v276_v29 }
  0x38   : > { %v788_v59 = vmul.u32.u64.low %v339_v30, %v338_v58  ;;  %v789_v60 = vmul.u32.u64.high %v339_v30, %v338_v58, %v788_v59  ;;  %v791_v61 = vmul.u32.u64.low %v339_v30, %v334_v57  ;;  %v792_v62 = vmul.u32.u64.high %v339_v30, %v334_v57, %v791_v61 }
  0x39   : > { %693 = vlog2.f32 %v278_v32 }
  0x3a   : > { %vm348_vm5 = vc.u32 %v789_v60, %v791_v61  ;;  %v349_v0 = vadd.s32 1, %v792_v62  ;;  %v347_v22 = vadd.s32 %v791_v61, %v789_v60 }
  0x3c   : > { %v350_v1 = vsel %vm348_vm5, %v349_v0, %v792_v62 }
  0x3d   : > { %v351_v2 = vadd.s32 %v350_v1, %v346_v63 }
  0x3f   : > { %v352_v3 = vadd.s32 536870912, %v351_v2 }
  0x41   : > { %v353_v5 = vshrl.u32 %v352_v3, 30  ;;  %v501_v3 = vld [vmem:[%s235_s25] sm:$0xff] }
  0x43   : > { %v354_v7 = vshll.u32 %v353_v5, 30  ;;  %v694_v37 = vpop.eup %693  ;;  %v377_v40 = vsub.s32 4, %v353_v5 }
  0x44   : > { %v281_v39 = vmul.f32 0.6931472, %v694_v37 }
  0x45   : > { %v355_v8 = vsub.s32 %v351_v2, %v354_v7  ;;  %v378_v43 = vsel %vm293_vm7, %v377_v40, %v353_v5 }
  0x46   : > { %v282_v42 = vmul.f32 -2.0, %v281_v39  ;;  %v380_v44 = vsel %vm292_vm8, 0, %v378_v43 }
  0x47   : > { %v357_v10 = vsub.s32 0, %v355_v8  ;;  %v488_v45 = vadd.s32 3, %v380_v44  ;;  %v384_v48 = vand.u32 3, %v380_v44 }
  0x48   : > { %vm285_vm13 = vcmp.eq.f32.partialorder %v282_v42, inf  ;;  %v288_v57 = vand.u32 2147483648, %v282_v42  ;;  %vm287_vm1 = vcmp.eq.f32.partialorder %v282_v42, 0.0 }
  0x49   : > { %v644_v11 = vmin.u32 %v357_v10, %v355_v8  ;;  %v489_v49 = vand.u32 3, %v488_v45  ;;  %vm386_vm9 = vcmp.eq.s32.totalorder %v384_v48, 0  ;;  %vm389_vm10 = vcmp.eq.s32.totalorder %v384_v48, 2 }
  0x4a   : > { %vm385_vm14 = vcmp.lt.s32.totalorder %v384_v48, 2 }
  0x4b   : > { %v359_v16 = vclz %v644_v11  ;;  %vm491_vm11 = vcmp.eq.s32.totalorder %v489_v49, 0  ;;  %vm494_vm12 = vcmp.eq.s32.totalorder %v489_v49, 2  ;;  %vm490_vm15 = vcmp.lt.s32.totalorder %v489_v49, 2 }
  0x4d   : > { %v645_v17 = vadd.s32 4294967294, %v359_v16 }
  0x4f   : > { %vm646_vm6 = vcmp.lt.s32.totalorder %v645_v17, 0 }
  0x50   : > { %v362_v20 = vsel %vm646_vm6, 0, %v645_v17 }
  0x51   : > { %v367_v21 = vsub.s32 4294967266, %v362_v20  ;;  %v363_v23 = vsub.s32 32, %v362_v20  ;;  %v364_v26 = vshll.u32 %v355_v8, %v362_v20 }
  0x53   : > { %v368_v25 = vadd.s32 127, %v367_v21  ;;  %v365_v27 = vshrl.u32 %v347_v22, %v363_v23 }
  0x55   : > { %v369_v28 = vshll.u32 %v368_v25, 23  ;;  %v366_v30 = vor.u32 %v365_v27, %v364_v26 }
  0x57   : > { %v370_v31 = vor.u32 4788187, %v369_v28  ;;  %v373_v34 = vcvt.s32.f32 %v366_v30 }
  0x59   : > { %v371_v33 = vand.u32 2147483647, %v370_v31 }
  0x5b   : > { %v374_v35 = vmul.f32 %v373_v34, %v371_v33 }
  0x5d   : > { %v375_v36 = vxor.u32 2147483648, %v374_v35 }
  0x5f   : > { %v376_v38 = vsel %vm293_vm7, %v375_v36, %v374_v35 }
  0x60   : > { %v379_v41 = vsel %vm292_vm8, %v782_v12, %v376_v38 }
  0x61   : > { %695 = vcosq.f32 %v379_v41 }
  0x62   : > { %697 = vsinq.f32 %v379_v41 }
  0x63   : > { %699 = vrsqrt.f32 %v282_v42 }
  0x6b   : > { %v696_v46 = vpop.eup %695 }
  0x6c   : > { %v698_v47 = vpop.eup %697  ;;  %v390_v52 = vxor.u32 2147483648, %v696_v46 }
  0x6d   : > { %v700_v50 = vpop.eup %699  ;;  %v387_v51 = vxor.u32 2147483648, %v698_v47 }
  0x6e   : > { %v284_v14 = vmul.f32 %v700_v50, %v282_v42  ;;  %v391_v54 = vsel %vm389_vm10, %v390_v52, %v698_v47  ;;  %v496_v56 = vsel %vm494_vm12, %v390_v52, %v698_v47 }
  0x6f   : > { %v388_v53 = vsel %vm386_vm9, %v696_v46, %v387_v51  ;;  %v493_v55 = vsel %vm491_vm11, %v696_v46, %v387_v51 }
  0x70   : > { %v286_v58 = vsel %vm285_vm13, %v282_v42, %v284_v14  ;;  %v392_v59 = vsel %vm385_vm14, %v388_v53, %v391_v54  ;;  %v497_v60 = vsel %vm490_vm15, %v493_v55, %v496_v56 }
  0x71   : > { %v289_v61 = vsel %vm287_vm1, %v288_v57, %v286_v58  ;;  %v393_v62 = vsel %vm383_vm0, nan, %v392_v59  ;;  %v498_v63 = vsel %vm383_vm0, nan, %v497_v60 }
  0x72   : > { %v394_v0 = vmul.f32 %v393_v62, %v289_v61  ;;  %v499_v1 = vmul.f32 %v498_v63, %v289_v61 }
  0x90   : > { %v510_v2 = vpop.permute.xlu0 %509 }
  0x91   : > { %v512_v5 = vmul.f32 %v510_v2, %v394_v0  ;;  %v513_v6 = vmul.f32 %v510_v2, %v499_v1 }
  0x93   : > { %v514_v12 = vadd.f32 %v512_v5, %v501_v3  ;;  %v515_v7 = vadd.f32 %v513_v6, %v502_v4 }
  0x95   : > { %516 = vst [vmem:[%s258_s28] sm:$0xff] %v514_v12  ;;  %517 = vst [vmem:[%s258_s28 + $0x8] sm:$0xff] %v515_v7 }
  0x96 PF: > { %s13_s14 = sadd.s32 1, %s723_s14   ;;  %s825_s12 = smov %s719_s13 }
  0x97   : > { %p10_p5 = scmp.ge.s32.totalorder %s13_s14, 4   ;;  %s826_s13 = smov %s828_s15 }
  0x99   :  { %12 = sbr.rel (!%p10_p5) target bundleno = 2 (0x2), region = 68 }

</bundles_post_ra>
